<compile_context>
chip_gen: v7x
topology: tpu7x:2x2x1
jax: 0.10.0
libtpu: 0.0.40
codegen_flags: <defaults>
</compile_context>

<pallas_src>
import functools

import jax
import jax.numpy as jnp
from jax.experimental import pallas as pl
from jax.experimental.pallas import tpu as pltpu

LOG_STD_MIN = -20.0
LOG_STD_MAX = 2.0

LANE = 128     # TPU lane width (last dim)
SUBLANE = 8    # f32 sublane count (second-to-last dim)


def _round_up(x, m):
    return ((x + m - 1) // m) * m


# ----------------------------------------------------------------------------
# Kernel
# ----------------------------------------------------------------------------
def policy_forward_kernel(num_actions,     # static (closed over via partial)
                          state_ref,       # [TILE_B, F]          (F = num_inputs)
                          w1_ref,          # [F, H_PAD]
                          wh_ref,          # [3, H_PAD, H_PAD]    (layers 2..4)
                          bh_ref,          # [4, H_PAD]           (biases 1..4)
                          whead_ref,       # [H_PAD, HEAD_PAD]    (mean | log_std)
                          bhead_ref,       # [1, HEAD_PAD]
                          head_ref):       # [TILE_B, HEAD_PAD]   (mean | log_std)
    h = state_ref[...]
    # layer 1
    h = jnp.maximum(
        jnp.dot(h, w1_ref[...], preferred_element_type=jnp.float32)
        + bh_ref[0:1, :], 0.0)
    # layers 2..4 (static unrolled over the packed slab)
    for l in range(3):
        h = jnp.maximum(
            jnp.dot(h, wh_ref[l], preferred_element_type=jnp.float32)
            + bh_ref[l + 1:l + 2, :], 0.0)

    # fused heads: single MXU matmul -> lane-dense [TILE_B, HEAD_PAD]
    head = (jnp.dot(h, whead_ref[...], preferred_element_type=jnp.float32)
            + bhead_ref[...])

    # clip only the log_std lanes (lane >= num_actions); mean lanes untouched,
    # zero-padded lanes are unaffected by the clip (clip(0) == 0).
    lane = jax.lax.broadcasted_iota(jnp.int32, head.shape, 1)
    head = jnp.where(lane >= num_actions,
                     jnp.clip(head, LOG_STD_MIN, LOG_STD_MAX),
                     head)
    head_ref[...] = head


# ----------------------------------------------------------------------------
# Host-side packing (done once per parameter set)
# ----------------------------------------------------------------------------
def pack_params(params, num_inputs, num_actions, hidden_size):
    """Pack weights into few lane-aligned slabs. Only output-feature dims are
    padded to 128 lanes; the input-feature dim is left at its true width."""
    h_pad = _round_up(hidden_size, LANE)
    head_pad = _round_up(2 * num_actions, LANE)

    w1 = jnp.zeros((num_inputs, h_pad), jnp.float32)
    w1 = w1.at[:, :hidden_size].set(params["w1"])

    wh = jnp.zeros((3, h_pad, h_pad), jnp.float32)
    wh = wh.at[0, :hidden_size, :hidden_size].set(params["w2"])
    wh = wh.at[1, :hidden_size, :hidden_size].set(params["w3"])
    wh = wh.at[2, :hidden_size, :hidden_size].set(params["w4"])

    bh = jnp.zeros((4, h_pad), jnp.float32)
    for i, name in enumerate(("b1", "b2", "b3", "b4")):
        bh = bh.at[i, :hidden_size].set(params[name][0])

    # both heads share one 128-lane tile: mean in [0:A], log_std in [A:2A]
    whead = jnp.zeros((h_pad, head_pad), jnp.float32)
    whead = whead.at[:hidden_size, :num_actions].set(params["wm"])
    whead = whead.at[:hidden_size, num_actions:2 * num_actions].set(params["ws"])

    bhead = jnp.zeros((1, head_pad), jnp.float32)
    bhead = bhead.at[0, :num_actions].set(params["bm"][0])
    bhead = bhead.at[0, num_actions:2 * num_actions].set(params["bs"][0])

    return {"w1": w1, "wh": wh, "bh": bh, "whead": whead, "bhead": bhead,
            "meta": (num_inputs, num_actions, hidden_size, h_pad, head_pad)}


# ----------------------------------------------------------------------------
# Wrapper
# ----------------------------------------------------------------------------
def policy_forward(state, packed, max_tile=4096):
    """state: [B, num_inputs] f32; packed: output of pack_params."""
    num_inputs, num_actions, _, h_pad, head_pad = packed["meta"]
    B = state.shape[0]

    # Batch tiling: single step for small batches; for large batches pick
    # tile_b so padding never exceeds one sublane group per step.
    n_steps = max(1, pl.cdiv(B, max_tile))
    tile_b = _round_up(pl.cdiv(B, n_steps), SUBLANE)
    b_pad = n_steps * tile_b

    if b_pad != B:
        state_p = jnp.zeros((b_pad, num_inputs), jnp.float32).at[:B, :].set(state)
    else:
        state_p = state

    grid = (n_steps,)

    flops = 2 * b_pad * (num_inputs * h_pad + 3 * h_pad * h_pad
                         + h_pad * head_pad)
    bytes_accessed = 4 * (state_p.size + packed["w1"].size + packed["wh"].size
                          + packed["bh"].size + packed["whead"].size
                          + packed["bhead"].size + b_pad * head_pad)

    kernel = functools.partial(policy_forward_kernel, num_actions)

    head = pl.pallas_call(
        kernel,
        out_shape=jax.ShapeDtypeStruct((b_pad, head_pad), jnp.float32),
        grid=grid,
        in_specs=[
            # state: tiled over batch, pipelined/double-buffered
            pl.BlockSpec((tile_b, num_inputs), lambda i: (i, 0)),
            # weights/biases: constant index_map -> stay VMEM-resident
            pl.BlockSpec((num_inputs, h_pad), lambda i: (0, 0)),
            pl.BlockSpec((3, h_pad, h_pad), lambda i: (0, 0, 0)),
            pl.BlockSpec((4, h_pad), lambda i: (0, 0)),
            pl.BlockSpec((h_pad, head_pad), lambda i: (0, 0)),
            pl.BlockSpec((1, head_pad), lambda i: (0, 0)),
        ],
        out_specs=pl.BlockSpec((tile_b, head_pad), lambda i: (i, 0)),
        compiler_params=pltpu.CompilerParams(
            # shards batch steps over v7x's 2 TCs when n_steps >= 2;
            # no-op on v5e/v6e or with a single step.
            dimension_semantics=("parallel",)),
        cost_estimate=pl.CostEstimate(flops=flops, transcendentals=0,
                                      bytes_accessed=bytes_accessed),
    )(state_p, packed["w1"], packed["wh"], packed["bh"],
      packed["whead"], packed["bhead"])

    mean = head[:B, :num_actions]
    log_std = head[:B, num_actions:2 * num_actions]
    return mean, log_std


# ----------------------------------------------------------------------------
# Init + pure-JAX reference
# ----------------------------------------------------------------------------
def init_params(key, num_inputs, num_actions, hidden_size, init_w=0.003):
    """Deterministic synthetic init matching nn.Linear shapes.

    PyTorch nn.Linear(in, out) has weight [out, in]; we store the transpose
    [in, out] so the kernel does x @ W. Hidden layers use the default
    U(-1/sqrt(in), 1/sqrt(in)); the two heads use U(-init_w, init_w).
    """
    keys = jax.random.split(key, 12)

    def uniform(k, shape, bound):
        return jax.random.uniform(k, shape, jnp.float32, -bound, bound)

    def hidden_layer(kw, kb, fan_in, fan_out):
        bound = 1.0 / jnp.sqrt(float(fan_in))
        return uniform(kw, (fan_in, fan_out), bound), uniform(kb, (1, fan_out), bound)

    w1, b1 = hidden_layer(keys[0], keys[1], num_inputs, hidden_size)
    w2, b2 = hidden_layer(keys[2], keys[3], hidden_size, hidden_size)
    w3, b3 = hidden_layer(keys[4], keys[5], hidden_size, hidden_size)
    w4, b4 = hidden_layer(keys[6], keys[7], hidden_size, hidden_size)
    wm = uniform(keys[8], (hidden_size, num_actions), init_w)
    bm = uniform(keys[9], (1, num_actions), init_w)
    ws = uniform(keys[10], (hidden_size, num_actions), init_w)
    bs = uniform(keys[11], (1, num_actions), init_w)

    return {"w1": w1, "b1": b1, "w2": w2, "b2": b2,
            "w3": w3, "b3": b3, "w4": w4, "b4": b4,
            "wm": wm, "bm": bm, "ws": ws, "bs": bs}


def reference_forward(state, p):
    """Pure-JAX reference for correctness check."""
    h = jnp.maximum(state @ p["w1"] + p["b1"], 0.0)
    h = jnp.maximum(h @ p["w2"] + p["b2"], 0.0)
    h = jnp.maximum(h @ p["w3"] + p["b3"], 0.0)
    h = jnp.maximum(h @ p["w4"] + p["b4"], 0.0)
    mean = h @ p["wm"] + p["bm"]
    log_std = jnp.clip(h @ p["ws"] + p["bs"], LOG_STD_MIN, LOG_STD_MAX)
    return mean, log_std


if __name__ == "__main__":
    BATCH = 8
    NUM_INPUTS = 32
    NUM_ACTIONS = 16
    HIDDEN = 64

    key = jax.random.PRNGKey(0)
    k_state, k_params = jax.random.split(key)

    state = jax.random.normal(k_state, (BATCH, NUM_INPUTS), jnp.float32)
    params = init_params(k_params, NUM_INPUTS, NUM_ACTIONS, HIDDEN)
    packed = pack_params(params, NUM_INPUTS, NUM_ACTIONS, HIDDEN)

    mean, log_std = jax.block_until_ready(policy_forward(state, packed))

    ref_mean, ref_log_std = reference_forward(state, params)
    assert mean.shape == (BATCH, NUM_ACTIONS) and log_std.shape == (BATCH, NUM_ACTIONS)
    assert jnp.allclose(mean, ref_mean, atol=1e-5, rtol=1e-5)
    assert jnp.allclose(log_std, ref_log_std, atol=1e-5, rtol=1e-5)

    print("KERNEL_OK")
</pallas_src>

<mosaic_0001>
module attributes {stable_mosaic.version = 11 : i64} {
  func.func @policy_forward_kernel(%arg0: i32, %arg1: memref<8x32xf32, #tpu.memory_space<vmem>>, %arg2: memref<32x128xf32, #tpu.memory_space<vmem>>, %arg3: memref<3x128x128xf32, #tpu.memory_space<vmem>>, %arg4: memref<4x128xf32, #tpu.memory_space<vmem>>, %arg5: memref<128x128xf32, #tpu.memory_space<vmem>>, %arg6: memref<1x128xf32, #tpu.memory_space<vmem>>, %arg7: memref<8x128xf32, #tpu.memory_space<vmem>>) attributes {dimension_semantics = [#tpu.dimension_semantics<parallel>], iteration_bounds = array<i64: 1>, scalar_prefetch = 0 : i64, scratch_operands = 0 : i64, tpu.core_type = #tpu.core_type<tc>, window_params = [{transform_indices = @transform_0, window_bounds = array<i64: 8, 32>}, {pipeline_mode = #tpu.pipeline_mode<synchronous>, transform_indices = @transform_1, window_bounds = array<i64: 32, 128>}, {pipeline_mode = #tpu.pipeline_mode<synchronous>, transform_indices = @transform_2, window_bounds = array<i64: 3, 128, 128>}, {pipeline_mode = #tpu.pipeline_mode<synchronous>, transform_indices = @transform_3, window_bounds = array<i64: 4, 128>}, {pipeline_mode = #tpu.pipeline_mode<synchronous>, transform_indices = @transform_4, window_bounds = array<i64: 128, 128>}, {pipeline_mode = #tpu.pipeline_mode<synchronous>, transform_indices = @transform_5, window_bounds = array<i64: 1, 128>}, {transform_indices = @transform_6, window_bounds = array<i64: 8, 128>}]} {
    %c0 = arith.constant 0 : index
    %c0_0 = arith.constant 0 : index
    %0 = vector.load %arg1[%c0, %c0_0] : memref<8x32xf32, #tpu.memory_space<vmem>>, vector<8x32xf32>
    %c0_1 = arith.constant 0 : index
    %c0_2 = arith.constant 0 : index
    %1 = vector.load %arg2[%c0_1, %c0_2] : memref<32x128xf32, #tpu.memory_space<vmem>>, vector<32x128xf32>
    %cst = arith.constant dense<0.000000e+00> : vector<8x128xf32>
    %2 = tpu.matmul %0, %1, %cst {dimension_numbers = #tpu.dot_dimension_numbers<[1], [0], [0], [1], [0, 0, 1, 1], [], []>} : vector<8x32xf32>, vector<32x128xf32>, vector<8x128xf32> -> vector<8x128xf32>
    %c0_3 = arith.constant 0 : index
    %c0_4 = arith.constant 0 : index
    %3 = vector.load %arg4[%c0_3, %c0_4] : memref<4x128xf32, #tpu.memory_space<vmem>>, vector<1x128xf32>
    %4 = vector.broadcast %3 : vector<1x128xf32> to vector<8x128xf32>
    %5 = arith.addf %2, %4 : vector<8x128xf32>
    %cst_5 = arith.constant 0.000000e+00 : f32
    %6 = vector.broadcast %cst_5 : f32 to vector<8x128xf32>
    %7 = arith.maximumf %5, %6 : vector<8x128xf32>
    %c0_6 = arith.constant 0 : index
    %c0_7 = arith.constant 0 : index
    %c0_8 = arith.constant 0 : index
    %8 = vector.load %arg3[%c0_6, %c0_7, %c0_8] : memref<3x128x128xf32, #tpu.memory_space<vmem>>, vector<1x128x128xf32>
    %9 = vector.shape_cast %8 : vector<1x128x128xf32> to vector<128x128xf32>
    %cst_9 = arith.constant dense<0.000000e+00> : vector<8x128xf32>
    %10 = tpu.matmul %7, %9, %cst_9 {dimension_numbers = #tpu.dot_dimension_numbers<[1], [0], [0], [1], [0, 0, 1, 1], [], []>} : vector<8x128xf32>, vector<128x128xf32>, vector<8x128xf32> -> vector<8x128xf32>
    %c1 = arith.constant 1 : index
    %c0_10 = arith.constant 0 : index
    %11 = vector.load %arg4[%c1, %c0_10] : memref<4x128xf32, #tpu.memory_space<vmem>>, vector<1x128xf32>
    %12 = vector.broadcast %11 : vector<1x128xf32> to vector<8x128xf32>
    %13 = arith.addf %10, %12 : vector<8x128xf32>
    %cst_11 = arith.constant 0.000000e+00 : f32
    %14 = vector.broadcast %cst_11 : f32 to vector<8x128xf32>
    %15 = arith.maximumf %13, %14 : vector<8x128xf32>
    %c1_12 = arith.constant 1 : index
    %c0_13 = arith.constant 0 : index
    %c0_14 = arith.constant 0 : index
    %16 = vector.load %arg3[%c1_12, %c0_13, %c0_14] : memref<3x128x128xf32, #tpu.memory_space<vmem>>, vector<1x128x128xf32>
    %17 = vector.shape_cast %16 : vector<1x128x128xf32> to vector<128x128xf32>
    %cst_15 = arith.constant dense<0.000000e+00> : vector<8x128xf32>
    %18 = tpu.matmul %15, %17, %cst_15 {dimension_numbers = #tpu.dot_dimension_numbers<[1], [0], [0], [1], [0, 0, 1, 1], [], []>} : vector<8x128xf32>, vector<128x128xf32>, vector<8x128xf32> -> vector<8x128xf32>
    %c2 = arith.constant 2 : index
    %c0_16 = arith.constant 0 : index
    %19 = vector.load %arg4[%c2, %c0_16] : memref<4x128xf32, #tpu.memory_space<vmem>>, vector<1x128xf32>
    %20 = vector.broadcast %19 : vector<1x128xf32> to vector<8x128xf32>
    %21 = arith.addf %18, %20 : vector<8x128xf32>
    %cst_17 = arith.constant 0.000000e+00 : f32
    %22 = vector.broadcast %cst_17 : f32 to vector<8x128xf32>
    %23 = arith.maximumf %21, %22 : vector<8x128xf32>
    %c2_18 = arith.constant 2 : index
    %c0_19 = arith.constant 0 : index
    %c0_20 = arith.constant 0 : index
    %24 = vector.load %arg3[%c2_18, %c0_19, %c0_20] : memref<3x128x128xf32, #tpu.memory_space<vmem>>, vector<1x128x128xf32>
    %25 = vector.shape_cast %24 : vector<1x128x128xf32> to vector<128x128xf32>
    %cst_21 = arith.constant dense<0.000000e+00> : vector<8x128xf32>
    %26 = tpu.matmul %23, %25, %cst_21 {dimension_numbers = #tpu.dot_dimension_numbers<[1], [0], [0], [1], [0, 0, 1, 1], [], []>} : vector<8x128xf32>, vector<128x128xf32>, vector<8x128xf32> -> vector<8x128xf32>
    %c3 = arith.constant 3 : index
    %c0_22 = arith.constant 0 : index
    %27 = vector.load %arg4[%c3, %c0_22] : memref<4x128xf32, #tpu.memory_space<vmem>>, vector<1x128xf32>
    %28 = vector.broadcast %27 : vector<1x128xf32> to vector<8x128xf32>
    %29 = arith.addf %26, %28 : vector<8x128xf32>
    %cst_23 = arith.constant 0.000000e+00 : f32
    %30 = vector.broadcast %cst_23 : f32 to vector<8x128xf32>
    %31 = arith.maximumf %29, %30 : vector<8x128xf32>
    %c0_24 = arith.constant 0 : index
    %c0_25 = arith.constant 0 : index
    %32 = vector.load %arg5[%c0_24, %c0_25] : memref<128x128xf32, #tpu.memory_space<vmem>>, vector<128x128xf32>
    %cst_26 = arith.constant dense<0.000000e+00> : vector<8x128xf32>
    %33 = tpu.matmul %31, %32, %cst_26 {dimension_numbers = #tpu.dot_dimension_numbers<[1], [0], [0], [1], [0, 0, 1, 1], [], []>} : vector<8x128xf32>, vector<128x128xf32>, vector<8x128xf32> -> vector<8x128xf32>
    %c0_27 = arith.constant 0 : index
    %c0_28 = arith.constant 0 : index
    %34 = vector.load %arg6[%c0_27, %c0_28] : memref<1x128xf32, #tpu.memory_space<vmem>>, vector<1x128xf32>
    %35 = vector.broadcast %34 : vector<1x128xf32> to vector<8x128xf32>
    %36 = arith.addf %33, %35 : vector<8x128xf32>
    %37 = tpu.iota {dimensions = array<i32: 1>} : vector<8x128xi32>
    %c16_i32 = arith.constant 16 : i32
    %38 = vector.broadcast %c16_i32 : i32 to vector<8x128xi32>
    %39 = arith.cmpi sge, %37, %38 : vector<8x128xi32>
    %cst_29 = arith.constant -2.000000e+01 : f32
    %cst_30 = arith.constant 2.000000e+00 : f32
    %40 = vector.broadcast %cst_29 : f32 to vector<8x128xf32>
    %41 = arith.maximumf %40, %36 : vector<8x128xf32>
    %42 = vector.broadcast %cst_30 : f32 to vector<8x128xf32>
    %43 = arith.minimumf %42, %41 : vector<8x128xf32>
    %44 = arith.select %39, %43, %36 : vector<8x128xi1>, vector<8x128xf32>
    %c0_31 = arith.constant 0 : index
    %c0_32 = arith.constant 0 : index
    %45 = vector.load %arg7[%c0_31, %c0_32] : memref<8x128xf32, #tpu.memory_space<vmem>>, vector<8x128xf32>
    tpu.vector_store %arg7[%c0_31, %c0_32], %44 {strides = array<i32>} : memref<8x128xf32, #tpu.memory_space<vmem>>, vector<8x128xf32>,
    return
  }
  func.func @transform_0(%arg0: i32) -> (i32, i32) {
    %c0_i32 = arith.constant 0 : i32
    %c0_i32_0 = arith.constant 0 : i32
    return %arg0, %c0_i32 : i32, i32
  }
  func.func @transform_1(%arg0: i32) -> (i32, i32) {
    %c0_i32 = arith.constant 0 : i32
    %c0_i32_0 = arith.constant 0 : i32
    %c0_i32_1 = arith.constant 0 : i32
    return %c0_i32, %c0_i32_0 : i32, i32
  }
  func.func @transform_2(%arg0: i32) -> (i32, i32, i32) {
    %c0_i32 = arith.constant 0 : i32
    %c0_i32_0 = arith.constant 0 : i32
    %c0_i32_1 = arith.constant 0 : i32
    %c0_i32_2 = arith.constant 0 : i32
    return %c0_i32, %c0_i32_0, %c0_i32_1 : i32, i32, i32
  }
  func.func @transform_3(%arg0: i32) -> (i32, i32) {
    %c0_i32 = arith.constant 0 : i32
    %c0_i32_0 = arith.constant 0 : i32
    %c0_i32_1 = arith.constant 0 : i32
    return %c0_i32, %c0_i32_0 : i32, i32
  }
  func.func @transform_4(%arg0: i32) -> (i32, i32) {
    %c0_i32 = arith.constant 0 : i32
    %c0_i32_0 = arith.constant 0 : i32
    %c0_i32_1 = arith.constant 0 : i32
    return %c0_i32, %c0_i32_0 : i32, i32
  }
  func.func @transform_5(%arg0: i32) -> (i32, i32) {
    %c0_i32 = arith.constant 0 : i32
    %c0_i32_0 = arith.constant 0 : i32
    %c0_i32_1 = arith.constant 0 : i32
    return %c0_i32, %c0_i32_0 : i32, i32
  }
  func.func @transform_6(%arg0: i32) -> (i32, i32) {
    %c0_i32 = arith.constant 0 : i32
    %c0_i32_0 = arith.constant 0 : i32
    return %arg0, %c0_i32 : i32, i32
  }
}

</mosaic_0001>

<bundles_post_ra>
// kernel: tpu_custom_call.1
= control target key start
LH: loop header
LB: loop body
LE: loop exit
PB: predicated region body
PF: predicated region fallthrough
CT: control target
= control target key end

     0   :  { %11 = vsyncpa [#allocation3], 0  ;;  %s1190_s0 = inlined_call_operand.hbm [shape: f32[8,32], index: 0, kind: input, shape index: {}]   ;;  %s1191_s1 = inlined_call_operand.hbm [shape: f32[32,128], index: 1, kind: input, shape index: {}]   ;;  %s1192_s2 = inlined_call_operand.hbm [shape: f32[3,128,128], index: 2, kind: input, shape index: {}]   ;;  %s1193_s3 = inlined_call_operand.vmem [shape: f32[4,128], index: 3, kind: input, shape index: {}]   ;;  %s1194_s4 = inlined_call_operand.hbm [shape: f32[128,128], index: 4, kind: input, shape index: {}]   ;;  %s1195_s5 = inlined_call_operand.vmem [shape: f32[1,128], index: 5, kind: input, shape index: {}]   ;;  %s1196_s6 = inlined_call_operand.hbm [shape: f32[8,128], index: 6, kind: output, shape index: {}]  }
   0x1   :  { %12 = vsyncpa [#allocation6], 0 }
   0x2   :  { %13 = vsyncpa [#allocation9], 0 }
   0x3   :  { %14 = vsyncpa [#allocation4], 0  ;;  %s1017_s21 = smov [#allocation5]   ;;  %s899_s25 = scalar_lea.hbm %s1191_s1, 512 }
   0x4   :  { %s30_s22 = sshll.u32 %s1017_s21, 4  ;;  %p900_p0 = scmp.ne.s32.totalorder %s1191_s1, %s899_s25  ;;  %s31_s22 = int_to_ptr.vmem [resolvable:$true] %s30_s22 }
   0x5   :  { %p903_p1 = scmp.lt.u32.totalorder %s899_s25, %s1191_s1 }
   0x7   :  { %p905_p2 = pnand %p903_p1, %p900_p0 }
   0x9   :  { %908 = shalt.err (!%p905_p2)
}
   0xa   :  { %s909_s30 = scalar_lea.vmem %s31_s22, 512  ;;  %p914_p4 = scmp.lt.s32.totalorder %s31_s22, %s31_s22 }
   0xb   :  { %p910_p3 = scmp.ne.s32.totalorder %s31_s22, %s909_s30  ;;  %p915_p5 = scmp.lt.s32.totalorder %s909_s30, %s909_s30 }
   0xd   :  { %p916_p6 = por %p915_p5, %p914_p4 }
   0xf   :  { %p917_p7 = pnand %p916_p6, %p910_p3 }
  0x11   :  { %920 = shalt.err (!%p917_p7)
}
  0x12   :  { %s1018_s7 = smov 128   ;;  %s1019_s8 = smov 8  }
  0x13   :  { %36 = dma.hbm_to_vmem [thread:$0]  %s1191_s1, 512, %s31_s22, [#allocation6], %s1018_s7, %s1018_s7, %s1019_s8  }
  0x14   :  { %s1020_s11 = smov [#allocation2]   ;;  %s1021_s13 = smov [#allocation7]  }
  0x15   :  { %s21_s12 = sshll.u32 %s1020_s11, 4  ;;  %s42_s14 = sshll.u32 %s1021_s13, 4  ;;  %s22_s12 = int_to_ptr.vmem [resolvable:$true] %s21_s12  ;;  %s43_s14 = int_to_ptr.vmem [resolvable:$true] %s42_s14 }
  0x16   :  { %s921_s17 = scalar_lea.hbm %s1190_s0, 128 }
  0x17   :  { %p922_p8 = scmp.ne.s32.totalorder %s1190_s0, %s921_s17  ;;  %p925_p9 = scmp.lt.u32.totalorder %s921_s17, %s1190_s0 }
  0x19   :  { %p927_p10 = pnand %p925_p9, %p922_p8 }
  0x1b   :  { %930 = shalt.err (!%p927_p10)
}
  0x1c   :  { %s931_s1 = scalar_lea.vmem %s22_s12, 128  ;;  %p936_p12 = scmp.lt.s32.totalorder %s22_s12, %s22_s12 }
  0x1d   :  { %p932_p11 = scmp.ne.s32.totalorder %s22_s12, %s931_s1  ;;  %p937_p13 = scmp.lt.s32.totalorder %s931_s1, %s931_s1 }
  0x1f   :  { %p938_p0 = por %p937_p13, %p936_p12 }
  0x21   :  { %p939_p1 = pnand %p938_p0, %p932_p11 }
  0x23   :  { %942 = shalt.err (!%p939_p1)
}
  0x24   :  { %24 = dma.hbm_to_vmem [thread:$0]  %s1190_s0, 128, %s22_s12, [#allocation3]  }
  0x25   :  { %s943_s26 = scalar_lea.hbm %s1192_s2, 6144 }
  0x26   :  { %p944_p2 = scmp.ne.s32.totalorder %s1192_s2, %s943_s26  ;;  %p947_p3 = scmp.lt.u32.totalorder %s943_s26, %s1192_s2 }
  0x28   :  { %p949_p4 = pnand %p947_p3, %p944_p2 }
  0x2a   :  { %952 = shalt.err (!%p949_p4)
}
  0x2b   :  { %s953_s9 = scalar_lea.vmem %s43_s14, 6144  ;;  %p958_p6 = scmp.lt.s32.totalorder %s43_s14, %s43_s14 }
  0x2c   :  { %p954_p5 = scmp.ne.s32.totalorder %s43_s14, %s953_s9  ;;  %p959_p7 = scmp.lt.s32.totalorder %s953_s9, %s953_s9 }
  0x2e   :  { %p960_p8 = por %p959_p7, %p958_p6 }
  0x30   :  { %p961_p9 = pnand %p960_p8, %p954_p5 }
  0x32   :  { %964 = shalt.err (!%p961_p9)
}
  0x33   :  { %48 = dma.hbm_to_vmem [thread:$0]  %s1192_s2, 6144, %s43_s14, [#allocation6], %s1018_s7, %s1018_s7, %s1019_s8  }
  0x34   :  { %s1022_s11 = smov [#allocation8]   ;;  %s965_s16 = scalar_lea.hbm %s1194_s4, 2048 }
  0x35   :  { %s56_s12 = sshll.u32 %s1022_s11, 4  ;;  %p966_p10 = scmp.ne.s32.totalorder %s1194_s4, %s965_s16  ;;  %s57_s12 = int_to_ptr.vmem [resolvable:$true] %s56_s12 }
  0x36   :  { %p969_p11 = scmp.lt.u32.totalorder %s965_s16, %s1194_s4 }
  0x38   :  { %p971_p12 = pnand %p969_p11, %p966_p10 }
  0x3a   :  { %974 = shalt.err (!%p971_p12)
}
  0x3b   :  { %s975_s21 = scalar_lea.vmem %s57_s12, 2048  ;;  %p980_p0 = scmp.lt.s32.totalorder %s57_s12, %s57_s12 }
  0x3c   :  { %p976_p13 = scmp.ne.s32.totalorder %s57_s12, %s975_s21  ;;  %p981_p1 = scmp.lt.s32.totalorder %s975_s21, %s975_s21 }
  0x3e   :  { %p982_p2 = por %p981_p1, %p980_p0 }
  0x40   :  { %p983_p3 = pnand %p982_p2, %p976_p13 }
  0x42   :  { %986 = shalt.err (!%p983_p3)
}
  0x43   :  { %62 = dma.hbm_to_vmem [thread:$0]  %s1194_s4, 2048, %s57_s12, [#allocation9], %s1018_s7, %s1018_s7, %s1019_s8  }
  0x44   :  { %1009 = dma.done.wait [#allocation3], 128  }
  0x45   :  { %1010 = vsyncadd [#allocation3], 4294967168 }
  0x46   :  { %1011 = dma.done.wait [#allocation6], 6656  }
  0x47   :  { %1012 = vsyncadd [#allocation6], 4294960640 }
  0x48   :  { %1013 = dma.done.wait [#allocation9], 2048  }
  0x49   :  { %1014 = vsyncadd [#allocation9], 4294965248  ;;  %v1023_v0 = vmov 0.0|0.0   ;;  %vm1024_vm0 = vmmov 0   ;;  %v1025_v1 = vmov 0.0   ;;  %v78_v2 = vld [vmem:[#allocation5] sm:$0xff] }
  0x4a   :  { %787 = vmatprep.subr.bf16.mxu0 %v1023_v0  ;;  %644 = vmatprep.mubr.msk.f32.mxu0 %vm1024_vm0, %v1025_v1  ;;  %v79_v3 = vld [vmem:[#allocation5 + $0x8] sm:$0xff]  ;;  %v80_v4 = vld [vmem:[#allocation5 + $0x10] sm:$0xff]  ;;  %v81_v6 = vld [vmem:[#allocation5 + $0x18] sm:$0xff]  ;;  %vm87_vm1 = vcmask 261120   ;;  %s1026_s28 = smov [#allocation10]  }
  0x4b   :  { %793 = vmatprep.subr.bf16.mxu1 %v1023_v0  ;;  %679 = vmatprep.mubr.msk.f32.mxu1 %vm1024_vm0, %v1025_v1  ;;  %v788_v5 = vpack.c.bf16 %v79_v3, %v78_v2  ;;  %v162_v7 = vld [vmem:[#allocation7] sm:$0xff]  ;;  %v163_v8 = vld [vmem:[#allocation7 + $0x8] sm:$0xff]  ;;  %v164_v9 = vld [vmem:[#allocation7 + $0x10] sm:$0xff]  ;;  %v791_v11 = vpack.c.bf16 %v81_v6, %v80_v4  ;;  %s546_s29 = sshll.u32 %s1026_s28, 4  ;;  %s547_s29 = int_to_ptr.vmem [resolvable:$true] %s546_s29 }
  0x4c   :  { %v165_v10 = vld [vmem:[#allocation7 + $0x18] sm:$0xff]  ;;  %v794_v12 = vpack.c.bf16 %v163_v8, %v162_v7  ;;  %v166_v14 = vld [vmem:[#allocation7 + $0x20] sm:$0xff]  ;;  %v167_v15 = vld [vmem:[#allocation7 + $0x28] sm:$0xff]  ;;  %p992_p5 = scmp.lt.s32.totalorder %s547_s29, %s547_s29 }
  0x4d   :  { %789 = vmatpush3.bf16.msra.mxu0 %v788_v5  ;;  %v797_v13 = vpack.c.bf16 %v165_v10, %v164_v9  ;;  %v77_v16 = vld [vmem:[#allocation2] sm:$0xff]  ;;  %v800_v17 = vpack.c.bf16 %v167_v15, %v166_v14  ;;  %v168_v18 = vld [vmem:[#allocation7 + $0x30] sm:$0xff]  ;;  %v170_v21 = vld [vmem:[#allocation7 + $0x40] sm:$0xff] }
  0x4e   :  { %790 = vmatprep.subr.bf16.mxu0 %v1023_v0  ;;  %795 = vmatpush3.bf16.msra.mxu1 %v794_v12  ;;  %v169_v19 = vld [vmem:[#allocation7 + $0x38] sm:$0xff]  ;;  %v171_v22 = vld [vmem:[#allocation7 + $0x48] sm:$0xff]  ;;  %v172_v24 = vld [vmem:[#allocation7 + $0x50] sm:$0xff] }
  0x4f   :  { %796 = vmatprep.subr.bf16.mxu1 %v1023_v0  ;;  %v803_v20 = vpack.c.bf16 %v169_v19, %v168_v18  ;;  %v806_v23 = vpack.c.bf16 %v171_v22, %v170_v21  ;;  %v173_v25 = vld [vmem:[#allocation7 + $0x58] sm:$0xff]  ;;  %v174_v27 = vld [vmem:[#allocation7 + $0x60] sm:$0xff]  ;;  %v175_v28 = vld [vmem:[#allocation7 + $0x68] sm:$0xff] }
  0x50   :  { %v809_v26 = vpack.c.bf16 %v173_v25, %v172_v24  ;;  %v812_v29 = vpack.c.bf16 %v175_v28, %v174_v27  ;;  %v176_v30 = vld [vmem:[#allocation7 + $0x70] sm:$0xff]  ;;  %v177_v31 = vld [vmem:[#allocation7 + $0x78] sm:$0xff]  ;;  %v255_v33 = vld [vmem:[#allocation7 + $0x80] sm:$0xff] }
  0x51   :  { %792 = vmatpush3.bf16.msra.mxu0 %v791_v11  ;;  %v815_v32 = vpack.c.bf16 %v177_v31, %v176_v30  ;;  %v256_v34 = vld [vmem:[#allocation7 + $0x88] sm:$0xff]  ;;  %v257_v35 = vld [vmem:[#allocation7 + $0x90] sm:$0xff]  ;;  %v258_v37 = vld [vmem:[#allocation7 + $0x98] sm:$0xff] }
  0x52   :  { %817 = vmatprep.subr.bf16.mxu0 %v1023_v0  ;;  %798 = vmatpush3.bf16.msra.mxu1 %v797_v13  ;;  %v818_v36 = vpack.c.bf16 %v256_v34, %v255_v33  ;;  %v821_v38 = vpack.c.bf16 %v258_v37, %v257_v35  ;;  %v259_v39 = vld [vmem:[#allocation7 + $0xa0] sm:$0xff]  ;;  %v260_v40 = vld [vmem:[#allocation7 + $0xa8] sm:$0xff]  ;;  %v261_v42 = vld [vmem:[#allocation7 + $0xb0] sm:$0xff] }
  0x53   :  { %799 = vmatprep.subr.bf16.mxu1 %v1023_v0  ;;  %v824_v41 = vpack.c.bf16 %v260_v40, %v259_v39  ;;  %v262_v43 = vld [vmem:[#allocation7 + $0xb8] sm:$0xff]  ;;  %v263_v45 = vld [vmem:[#allocation7 + $0xc0] sm:$0xff]  ;;  %v264_v46 = vld [vmem:[#allocation7 + $0xc8] sm:$0xff] }
  0x54   :  { %645 = vmatmul.mubr.msk.f32.vlgmr.msra.gmra.mrb[0].mxu0 %vm87_vm1, %v77_v16  ;;  %v827_v44 = vpack.c.bf16 %v262_v43, %v261_v42  ;;  %v830_v47 = vpack.c.bf16 %v264_v46, %v263_v45  ;;  %v265_v48 = vld [vmem:[#allocation7 + $0xd0] sm:$0xff]  ;;  %v266_v49 = vld [vmem:[#allocation7 + $0xd8] sm:$0xff]  ;;  %v267_v51 = vld [vmem:[#allocation7 + $0xe0] sm:$0xff] }
  0x55   :  { %714 = vmatprep.mubr.msk.f32.mxu0 %vm1024_vm0, %v1025_v1  ;;  %819 = vmatpush3.bf16.msra.mxu0 %v818_v36  ;;  %v833_v50 = vpack.c.bf16 %v266_v49, %v265_v48  ;;  %v268_v52 = vld [vmem:[#allocation7 + $0xe8] sm:$0xff]  ;;  %v557_v54 = vld [vmem:[%s1193_s3] ss:$0 sm:$0xff]  ;;  %v269_v59 = vld [vmem:[#allocation7 + $0xf0] sm:$0xff] }
  0x56   :  { %801 = vmatpush3.bf16.msra.mxu1 %v800_v17  ;;  %820 = vmatprep.subr.bf16.mxu0 %v1023_v0  ;;  %v836_v53 = vpack.c.bf16 %v268_v52, %v267_v51  ;;  %v270_v60 = vld [vmem:[#allocation7 + $0xf8] sm:$0xff]  ;;  %v348_v62 = vld [vmem:[#allocation7 + $0x100] sm:$0xff]  ;;  %v349_v63 = vld [vmem:[#allocation7 + $0x108] sm:$0xff] }
  0x57   :  { %802 = vmatprep.subr.bf16.mxu1 %v1023_v0  ;;  %v839_v61 = vpack.c.bf16 %v270_v60, %v269_v59  ;;  %v350_v2 = vld [vmem:[#allocation7 + $0x110] sm:$0xff]  ;;  %v842_v3 = vpack.c.bf16 %v349_v63, %v348_v62  ;;  %v351_v4 = vld [vmem:[#allocation7 + $0x118] sm:$0xff]  ;;  %v352_v6 = vld [vmem:[#allocation7 + $0x120] sm:$0xff] }
  0x58   :  { %v845_v5 = vpack.c.bf16 %v351_v4, %v350_v2  ;;  %v353_v7 = vld [vmem:[#allocation7 + $0x128] sm:$0xff]  ;;  %v354_v9 = vld [vmem:[#allocation7 + $0x130] sm:$0xff]  ;;  %v355_v10 = vld [vmem:[#allocation7 + $0x138] sm:$0xff] }
  0x59   :  { %822 = vmatpush3.bf16.msra.mxu0 %v821_v38  ;;  %v848_v8 = vpack.c.bf16 %v353_v7, %v352_v6  ;;  %v851_v11 = vpack.c.bf16 %v355_v10, %v354_v9  ;;  %v356_v12 = vld [vmem:[#allocation7 + $0x140] sm:$0xff]  ;;  %v357_v13 = vld [vmem:[#allocation7 + $0x148] sm:$0xff]  ;;  %v358_v15 = vld [vmem:[#allocation7 + $0x150] sm:$0xff] }
  0x5a   :  { %804 = vmatpush3.bf16.msra.mxu1 %v803_v20  ;;  %823 = vmatprep.subr.bf16.mxu0 %v1023_v0  ;;  %v854_v14 = vpack.c.bf16 %v357_v13, %v356_v12  ;;  %v359_v16 = vld [vmem:[#allocation7 + $0x158] sm:$0xff]  ;;  %v360_v18 = vld [vmem:[#allocation7 + $0x160] sm:$0xff]  ;;  %v361_v19 = vld [vmem:[#allocation7 + $0x168] sm:$0xff] }
  0x5b   :  { %805 = vmatprep.subr.bf16.mxu1 %v1023_v0  ;;  %v857_v17 = vpack.c.bf16 %v359_v16, %v358_v15  ;;  %v860_v20 = vpack.c.bf16 %v361_v19, %v360_v18  ;;  %v559_v21 = vld [vmem:[%s1193_s3 + $0x1] ss:$0 sm:$0xff]  ;;  %v441_v30 = vld [vmem:[#allocation8 + $0x8] sm:$0xff]  ;;  %v442_v31 = vld [vmem:[#allocation8 + $0x10] sm:$0xff] }
  0x5c   :  { %v363_v27 = vld [vmem:[#allocation7 + $0x178] sm:$0xff]  ;;  %v444_v35 = vld [vmem:[#allocation8 + $0x20] sm:$0xff]  ;;  %v445_v36 = vld [vmem:[#allocation8 + $0x28] sm:$0xff] }
  0x5d   :  { %825 = vmatpush3.bf16.msra.mxu0 %v824_v41  ;;  %v443_v33 = vld [vmem:[#allocation8 + $0x18] sm:$0xff]  ;;  %v872_v37 = vpack.c.bf16 %v445_v36, %v444_v35  ;;  %v448_v40 = vld [vmem:[#allocation8 + $0x40] sm:$0xff]  ;;  %v449_v41 = vld [vmem:[#allocation8 + $0x48] sm:$0xff] }
  0x5e   :  { %807 = vmatpush3.bf16.msra.mxu1 %v806_v23  ;;  %826 = vmatprep.subr.bf16.mxu0 %v1023_v0  ;;  %v869_v34 = vpack.c.bf16 %v443_v33, %v442_v31  ;;  %v447_v38 = vld [vmem:[#allocation8 + $0x38] sm:$0xff]  ;;  %v878_v42 = vpack.c.bf16 %v449_v41, %v448_v40  ;;  %v450_v43 = vld [vmem:[#allocation8 + $0x50] sm:$0xff]  ;;  %v452_v46 = vld [vmem:[#allocation8 + $0x60] sm:$0xff] }
  0x5f   :  { %808 = vmatprep.subr.bf16.mxu1 %v1023_v0  ;;  %v560_v49 = vld [vmem:[%s1193_s3 + $0x2] ss:$0 sm:$0xff]  ;;  %v562_v62 = vld [vmem:[%s1195_s5] ss:$0 sm:$0xff] }
  0x61   :  { %828 = vmatpush3.bf16.msra.mxu0 %v827_v44  ;;  %v451_v44 = vld [vmem:[#allocation8 + $0x58] sm:$0xff] }
  0x62   :  { %810 = vmatpush3.bf16.msra.mxu1 %v809_v26  ;;  %829 = vmatprep.subr.bf16.mxu0 %v1023_v0  ;;  %v362_v26 = vld [vmem:[#allocation7 + $0x170] sm:$0xff]  ;;  %v881_v45 = vpack.c.bf16 %v451_v44, %v450_v43 }
  0x63   :  { %811 = vmatprep.subr.bf16.mxu1 %v1023_v0  ;;  %v863_v28 = vpack.c.bf16 %v363_v27, %v362_v26 }
  0x65   :  { %831 = vmatpush3.bf16.msra.mxu0 %v830_v47  ;;  %v453_v47 = vld [vmem:[#allocation8 + $0x68] sm:$0xff] }
  0x66   :  { %813 = vmatpush3.bf16.msra.mxu1 %v812_v29  ;;  %832 = vmatprep.subr.bf16.mxu0 %v1023_v0  ;;  %v440_v29 = vld [vmem:[#allocation8] sm:$0xff]  ;;  %v884_v48 = vpack.c.bf16 %v453_v47, %v452_v46 }
  0x67   :  { %814 = vmatprep.subr.bf16.mxu1 %v1023_v0 }
  0x69   :  { %834 = vmatpush3.bf16.msra.mxu0 %v833_v50 }
  0x6a   :  { %816 = vmatpush3.bf16.msra.mxu1 %v815_v32  ;;  %835 = vmatprep.subr.bf16.mxu0 %v1023_v0  ;;  %v866_v32 = vpack.c.bf16 %v441_v30, %v440_v29 }
  0x6b   :  { %841 = vmatprep.subr.bf16.mxu1 %v1023_v0 }
  0x6d   :  { %837 = vmatpush3.bf16.msra.mxu0 %v836_v53 }
  0x6e   :  { %838 = vmatprep.subr.bf16.mxu0 %v1023_v0 }
  0x71   :  { %840 = vmatpush3.bf16.msra.mxu0 %v839_v61  ;;  %v533_v61 = vlaneseq }
  0x72   :  { %865 = vmatprep.subr.bf16.mxu0 %v1023_v0 }
  0x73   :  { %v534_v2 = vand.u32 127, %v533_v61 }
  0x75   :  { %vm535_vm2 = vcmp.ge.s32.totalorder %v534_v2, 16 }
 0x127   :  { %v157_v55 = vpop.f32.mrb[0].mxu0 }
 0x128   :  { %v158_v56 = vadd.f32 %v557_v54, %v157_v55  ;;  %v646_v57 = vpop.f32.mrb[1].mxu0  ;;  %v454_v54 = vld [vmem:[#allocation8 + $0x70] sm:$0xff]  ;;  %v455_v55 = vld [vmem:[#allocation8 + $0x78] sm:$0xff] }
 0x129   :  { %v561_v57 = vld [vmem:[%s1193_s3 + $0x3] ss:$0 sm:$0xff]  ;;  %s987_s3 = scalar_lea.vmem %s547_s29, 128 }
 0x12a   :  { %v161_v58 = vmax.f32 %v158_v56, 0.0  ;;  %v887_v56 = vpack.c.bf16 %v455_v55, %v454_v54  ;;  %p988_p4 = scmp.ne.s32.totalorder %s547_s29, %s987_s3  ;;  %p993_p6 = scmp.lt.s32.totalorder %s987_s3, %s987_s3 }
 0x12c   :  { %680 = vmatmul.mubr.f32.vlgmr.msra.gmra.mrb[0].mxu1 %v161_v58  ;;  %p994_p7 = por %p993_p6, %p992_p5 }
 0x12d   :  { %749 = vmatprep.mubr.msk.f32.mxu1 %vm1024_vm0, %v1025_v1  ;;  %843 = vmatpush3.bf16.msra.mxu1 %v842_v3 }
 0x12e   :  { %844 = vmatprep.subr.bf16.mxu1 %v1023_v0  ;;  %p995_p8 = pnand %p994_p7, %p988_p4 }
 0x131   :  { %846 = vmatpush3.bf16.msra.mxu1 %v845_v5 }
 0x132   :  { %847 = vmatprep.subr.bf16.mxu1 %v1023_v0 }
 0x135   :  { %849 = vmatpush3.bf16.msra.mxu1 %v848_v8 }
 0x136   :  { %850 = vmatprep.subr.bf16.mxu1 %v1023_v0 }
 0x139   :  { %852 = vmatpush3.bf16.msra.mxu1 %v851_v11 }
 0x13a   :  { %853 = vmatprep.subr.bf16.mxu1 %v1023_v0 }
 0x13d   :  { %855 = vmatpush3.bf16.msra.mxu1 %v854_v14 }
 0x13e   :  { %856 = vmatprep.subr.bf16.mxu1 %v1023_v0 }
 0x141   :  { %858 = vmatpush3.bf16.msra.mxu1 %v857_v17 }
 0x142   :  { %859 = vmatprep.subr.bf16.mxu1 %v1023_v0 }
 0x145   :  { %861 = vmatpush3.bf16.msra.mxu1 %v860_v20 }
 0x146   :  { %862 = vmatprep.subr.bf16.mxu1 %v1023_v0 }
 0x149   :  { %864 = vmatpush3.bf16.msra.mxu1 %v863_v28 }
 0x1ff   :  { %v249_v22 = vpop.f32.mrb[0].mxu1 }
 0x200   :  { %v250_v23 = vadd.f32 %v559_v21, %v249_v22  ;;  %v681_v24 = vpop.f32.mrb[1].mxu1 }
 0x202   :  { %v253_v25 = vmax.f32 %v250_v23, 0.0 }
 0x204   :  { %715 = vmatmul.mubr.f32.vlgmr.msra.gmra.mrb[2].mxu0 %v253_v25 }
 0x205   :  { %784 = vmatprep.mubr.msk.f32.mxu0 %vm1024_vm0, %v1025_v1  ;;  %867 = vmatpush3.bf16.msra.mxu0 %v866_v32  ;;  %v446_v1 = vld [vmem:[#allocation8 + $0x30] sm:$0xff] }
 0x206   :  { %868 = vmatprep.subr.bf16.mxu0 %v1023_v0  ;;  %v875_v39 = vpack.c.bf16 %v447_v38, %v446_v1 }
 0x209   :  { %870 = vmatpush3.bf16.msra.mxu0 %v869_v34 }
 0x20a   :  { %871 = vmatprep.subr.bf16.mxu0 %v1023_v0 }
 0x20d   :  { %873 = vmatpush3.bf16.msra.mxu0 %v872_v37 }
 0x20e   :  { %874 = vmatprep.subr.bf16.mxu0 %v1023_v0 }
 0x211   :  { %876 = vmatpush3.bf16.msra.mxu0 %v875_v39 }
 0x212   :  { %877 = vmatprep.subr.bf16.mxu0 %v1023_v0 }
 0x215   :  { %879 = vmatpush3.bf16.msra.mxu0 %v878_v42 }
 0x216   :  { %880 = vmatprep.subr.bf16.mxu0 %v1023_v0 }
 0x219   :  { %882 = vmatpush3.bf16.msra.mxu0 %v881_v45 }
 0x21a   :  { %883 = vmatprep.subr.bf16.mxu0 %v1023_v0 }
 0x21d   :  { %885 = vmatpush3.bf16.msra.mxu0 %v884_v48 }
 0x21e   :  { %886 = vmatprep.subr.bf16.mxu0 %v1023_v0 }
 0x221   :  { %888 = vmatpush3.bf16.msra.mxu0 %v887_v56 }
 0x2d7   :  { %v342_v50 = vpop.f32.mrb[2].mxu0 }
 0x2d8   :  { %v343_v51 = vadd.f32 %v560_v49, %v342_v50  ;;  %v716_v52 = vpop.f32.mrb[3].mxu0 }
 0x2da   :  { %v346_v53 = vmax.f32 %v343_v51, 0.0 }
 0x2dc   :  { %750 = vmatmul.mubr.f32.vlgmr.msra.gmra.mrb[2].mxu1 %v346_v53 }
 0x3af   :  { %v435_v58 = vpop.f32.mrb[2].mxu1 }
 0x3b0   :  { %v436_v59 = vadd.f32 %v561_v57, %v435_v58  ;;  %v751_v0 = vpop.f32.mrb[3].mxu1 }
 0x3b2   :  { %v439_v60 = vmax.f32 %v436_v59, 0.0 }
 0x3b4   :  { %785 = vmatmul.mubr.f32.vlgmr.msra.gmra.mrb[4].mxu0 %v439_v60 }
 0x487   :  { %v529_v63 = vpop.f32.mrb[4].mxu0 }
 0x488   :  { %v530_v3 = vadd.f32 %v562_v62, %v529_v63  ;;  %v786_v4 = vpop.f32.mrb[5].mxu0 }
 0x48a   :  { %v536_v5 = vmax.f32 %v530_v3, -20.0 }
 0x48c   :  { %v537_v6 = vmin.f32 %v536_v5, 2.0 }
 0x48e   :  { %v538_v7 = vsel %vm535_vm2, %v537_v6, %v530_v3 }
 0x48f   :  { %539 = vst [vmem:[#allocation10] sm:$0xff] %v538_v7 }
 0x490   :  { %998 = shalt.err (!%p995_p8)
}
 0x491   :  { %s999_s9 = scalar_lea.hbm %s1196_s6, 128 }
 0x492   :  { %p1000_p9 = scmp.ne.s32.totalorder %s1196_s6, %s999_s9  ;;  %p1003_p10 = scmp.lt.u32.totalorder %s999_s9, %s1196_s6 }
 0x494   :  { %p1005_p11 = pnand %p1003_p10, %p1000_p9 }
 0x496   :  { %1008 = shalt.err (!%p1005_p11)
}
 0x497   :  { %549 = dma.vmem_to_hbm [thread:$0]  %s547_s29, 128, %s1196_s6, [#allocation4]  }
 0x498   :  { %1015 = dma.done.wait [#allocation4], 128  }
 0x499   :  { %1016 = vsyncadd [#allocation4], 4294967168 }
 0x49a   :  { %553 = vsyncpa [#allocation3], 1 }
 0x49b   :  { %554 = vsyncpa [#allocation6], 1 }
 0x49c   :  { %555 = vsyncpa [#allocation9], 1 }
 0x49d   :  { %556 = vsyncpa [#allocation4], 1 }

</bundles_post_ra>
